<compile_context>
chip_gen: v6e
topology: v6e:2x2x1
jax: 0.10.0
libtpu: 0.0.40
codegen_flags: <defaults>
</compile_context>

<pallas_src>
import jax
import jax.numpy as jnp
from jax.experimental import pallas as pl
from jax.experimental.pallas import tpu as pltpu


def _round_up(x, m):
    return ((x + m - 1) // m) * m


# -----------------------------------------------------------------------------
# Kernel: one (batch-tile, hidden-tile) grid step.
#   h_k  = relu(x @ w1[:, k] + b1[k])          (f32 on MXU/VPU)
#   acc += h_k @ w2[k, :]                      (bf16 operands, f32 accumulate)
#   on last k: out = acc + b2
# -----------------------------------------------------------------------------
def expert_kernel(x_ref, w1_ref, b1_ref, w2_ref, b2_ref, o_ref, acc_ref):
    k = pl.program_id(1)

    @pl.when(k == 0)
    def _init():
        acc_ref[...] = jnp.zeros_like(acc_ref)

    # fc1 tile: [bm, in] @ [in, bh] -> f32 accumulation on the MXU.
    h = jnp.dot(x_ref[...], w1_ref[...], preferred_element_type=jnp.float32)
    # Bias add + ReLU in f32 on the VPU.
    h = jnp.maximum(h + b1_ref[...], 0.0)
    # TODO(synk): Dropout(p=0.3) is identity at inference; training-mode
    # masking (pltpu.prng_seed + pltpu.prng_random_bits + rescale) is
    # intentionally not implemented.
    # fc2 partial product: cast h to the weight dtype (bf16) so BOTH MXU
    # operands take the fast bf16 path; accumulation stays f32 in scratch.
    acc_ref[...] += jnp.dot(h.astype(w2_ref.dtype), w2_ref[...],
                            preferred_element_type=jnp.float32)

    @pl.when(k == pl.num_programs(1) - 1)
    def _finalize():
        o_ref[...] = (acc_ref[...] + b2_ref[...]).astype(o_ref.dtype)


# -----------------------------------------------------------------------------
# One-time weight preparation: pad feature axes to lane-dense multiples of 128
# (hidden additionally to a multiple of the hidden tile) and cast to bf16.
# Padding is mathematically exact: padded w1 columns / b1 entries are 0 so
# relu gives 0, padded w2 rows contribute 0, padded output columns are sliced
# off after the call.
# -----------------------------------------------------------------------------
def prepare_expert_weights(w1, b1, w2, b2, *, compute_dtype=jnp.bfloat16,
                           block_h=None):
    in_size, hidden = w1.shape
    out_size = w2.shape[1]
    b1 = jnp.asarray(b1).reshape(1, hidden).astype(jnp.float32)
    b2 = jnp.asarray(b2).reshape(1, out_size).astype(jnp.float32)

    hidden_128 = _round_up(hidden, 128)
    if block_h is None:
        # <=512-wide hidden tiles, sized to the (padded) hidden dim.
        n_h = pl.cdiv(hidden_128, 512)
        block_h = _round_up(pl.cdiv(hidden_128, n_h), 128)
    assert block_h % 128 == 0, "hidden tile must be lane-dense (multiple of 128)"
    hidden_p = _round_up(hidden_128, block_h)
    out_p = _round_up(out_size, 128)

    w1p = jnp.pad(w1, ((0, 0), (0, hidden_p - hidden))).astype(compute_dtype)
    b1p = jnp.pad(b1, ((0, 0), (0, hidden_p - hidden)))            # f32 bias
    w2p = jnp.pad(w2, ((0, hidden_p - hidden),
                       (0, out_p - out_size))).astype(compute_dtype)
    b2p = jnp.pad(b2, ((0, 0), (0, out_p - out_size)))              # f32 bias

    return dict(w1=w1p, b1=b1p, w2=w2p, b2=b2p,
                block_h=block_h, out_size=out_size,
                compute_dtype=compute_dtype)


def _choose_block_m(B, sublane):
    """Pick the number of batch tiles first, then size the tile to the batch."""
    B_al = _round_up(max(B, sublane), sublane)
    # Target <=512-row tiles (measured ~85% of HBM roofline vs ~63% at 256).
    n = pl.cdiv(B_al, 512)
    # v7x has 2 TensorCores: make sure 'parallel' has >=2 grid steps to shard
    # whenever the batch is big enough to matter.
    if B_al >= 64:
        n = max(n, 2)
    return _round_up(pl.cdiv(B_al, n), sublane)


def expert_forward(x, params, *, block_m=None):
    """Fused Expert forward: relu(x @ w1 + b1) @ w2 + b2.

    x:      [B, input_size]
    params: output of prepare_expert_weights (padded, bf16-cast weights).
    """
    w1, b1, w2, b2 = params["w1"], params["b1"], params["w2"], params["b2"]
    block_h = params["block_h"]
    out_size = params["out_size"]
    compute_dtype = params["compute_dtype"]

    B, in_size = x.shape
    assert in_size == w1.shape[0], "input_size mismatch with prepared weights"
    hidden_p = w1.shape[1]
    out_p = w2.shape[1]
    n_h = hidden_p // block_h
    out_dtype = x.dtype

    itemsize_c = 2 if compute_dtype in (jnp.bfloat16, jnp.float16) else 4
    sublane = 16 if itemsize_c == 2 else 8

    # ---- Batch tiling -------------------------------------------------------
    if block_m is None:
        block_m = _choose_block_m(B, sublane)
    else:
        block_m = _round_up(block_m, sublane)
    B_pad = _round_up(B, block_m)
    n_b = B_pad // block_m

    # Cast activations to the MXU compute dtype; pad the batch tail.
    xk = x.astype(compute_dtype)
    if B_pad != B:
        xk = jnp.pad(xk, ((0, B_pad - B), (0, 0)))

    # ---- Scheduler hints ----------------------------------------------------
    flops = 2 * B_pad * (in_size * hidden_p + hidden_p * out_p)
    bytes_accessed = (
        B_pad * in_size * itemsize_c
        + n_b * (in_size * hidden_p + hidden_p * out_p) * itemsize_c   # streamed weights
        + (hidden_p + out_p) * 4                                       # biases
        + B_pad * out_p * jnp.zeros((), out_dtype).dtype.itemsize)

    # ---- VMEM budget (double buffers + accumulator + intermediate) ----------
    out_itemsize = jnp.zeros((), out_dtype).dtype.itemsize
    vmem_est = (2 * block_m * in_size * itemsize_c        # x
                + 2 * in_size * block_h * itemsize_c      # w1 tile
                + 2 * block_h * 4                         # b1 tile (f32)
                + 2 * block_h * out_p * itemsize_c        # w2 tile
                + 2 * out_p * 4                           # b2 (f32)
                + 2 * block_m * out_p * out_itemsize      # out
                + block_m * out_p * 4                     # f32 accumulator
                + block_m * block_h * 4)                  # fc1 intermediate
    vmem_limit = int(max(32 * 2 ** 20, min(2 * vmem_est, 64 * 2 ** 20)))

    out = pl.pallas_call(
        expert_kernel,
        out_shape=jax.ShapeDtypeStruct((B_pad, out_p), out_dtype),
        grid_spec=pltpu.PrefetchScalarGridSpec(
            num_scalar_prefetch=0,
            grid=(n_b, n_h),                       # reduction (hidden) axis last
            in_specs=[
                pl.BlockSpec((block_m, in_size), lambda i, k: (i, 0)),   # x
                pl.BlockSpec((in_size, block_h), lambda i, k: (0, k)),   # w1
                pl.BlockSpec((1, block_h), lambda i, k: (0, k)),         # b1
                pl.BlockSpec((block_h, out_p), lambda i, k: (k, 0)),     # w2
                pl.BlockSpec((1, out_p), lambda i, k: (0, 0)),           # b2
            ],
            # Output block constant across k -> resident accumulator target.
            out_specs=pl.BlockSpec((block_m, out_p), lambda i, k: (i, 0)),
            scratch_shapes=[pltpu.VMEM((block_m, out_p), jnp.float32)],
        ),
        compiler_params=pltpu.CompilerParams(
            dimension_semantics=("parallel", "arbitrary"),
            vmem_limit_bytes=vmem_limit,
        ),
        cost_estimate=pl.CostEstimate(
            flops=flops, transcendentals=0, bytes_accessed=bytes_accessed),
    )(xk, w1, b1, w2, b2)

    # Strip batch and output-lane padding.
    return out[:B, :out_size]


if __name__ == "__main__":
    # Small shapes consistent with the module's forward.
    batch = 8
    input_size = 32
    hidden_size = 64
    output_size = 16

    key = jax.random.PRNGKey(0)
    kx, kw1, kb1, kw2, kb2, kx2, kw3, kb3, kw4, kb4 = jax.random.split(key, 10)

    # Deterministic PyTorch-style uniform init: U(-1/sqrt(fan_in), 1/sqrt(fan_in))
    bound1 = 1.0 / (input_size ** 0.5)
    bound2 = 1.0 / (hidden_size ** 0.5)

    x = jax.random.normal(kx, (batch, input_size), dtype=jnp.float32)
    w1 = jax.random.uniform(kw1, (input_size, hidden_size),
                            minval=-bound1, maxval=bound1, dtype=jnp.float32)
    b1 = jax.random.uniform(kb1, (1, hidden_size),
                            minval=-bound1, maxval=bound1, dtype=jnp.float32)
    w2 = jax.random.uniform(kw2, (hidden_size, output_size),
                            minval=-bound2, maxval=bound2, dtype=jnp.float32)
    b2 = jax.random.uniform(kb2, (1, output_size),
                            minval=-bound2, maxval=bound2, dtype=jnp.float32)

    def ref_bf16(xv, W1, B1, W2, B2):
        # Matches the kernel's bf16-operand / f32-accumulate numerics.
        h = jnp.dot(xv.astype(jnp.bfloat16), W1.astype(jnp.bfloat16),
                    preferred_element_type=jnp.float32) + B1
        h = jnp.maximum(h, 0.0)
        return jnp.dot(h.astype(jnp.bfloat16), W2.astype(jnp.bfloat16),
                       preferred_element_type=jnp.float32) + B2

    # Case 1: tiny batch -> single grid step, whole (padded) batch at once.
    params = prepare_expert_weights(w1, b1, w2, b2)
    out = jax.block_until_ready(expert_forward(x, params))
    assert out.shape == (batch, output_size)
    assert jnp.allclose(out, ref_bf16(x, w1, b1, w2, b2),
                        atol=1e-2, rtol=1e-2), "mismatch vs bf16 ref (B=8)"
    ref_f32 = jnp.maximum(x @ w1 + b1, 0.0) @ w2 + b2
    assert jnp.allclose(out, ref_f32, atol=5e-2, rtol=5e-2), \
        "mismatch vs f32 ref (B=8)"

    # Case 2: non-divisible batch (2 batch tiles of 160) and a hidden axis
    # split into 2 tiles (exercises the f32 accumulator / pl.when path).
    batch2 = 300
    hidden2 = 256
    bound3 = 1.0 / (hidden2 ** 0.5)
    w1b = jax.random.uniform(kw3, (input_size, hidden2),
                             minval=-bound1, maxval=bound1, dtype=jnp.float32)
    b1b = jax.random.uniform(kb3, (1, hidden2),
                             minval=-bound1, maxval=bound1, dtype=jnp.float32)
    w2b = jax.random.uniform(kw4, (hidden2, output_size),
                             minval=-bound3, maxval=bound3, dtype=jnp.float32)
    b2b = jax.random.uniform(kb4, (1, output_size),
                             minval=-bound3, maxval=bound3, dtype=jnp.float32)
    x2 = jax.random.normal(kx2, (batch2, input_size), dtype=jnp.float32)

    params2 = prepare_expert_weights(w1b, b1b, w2b, b2b, block_h=128)
    out2 = jax.block_until_ready(expert_forward(x2, params2))
    assert out2.shape == (batch2, output_size)
    assert jnp.allclose(out2, ref_bf16(x2, w1b, b1b, w2b, b2b),
                        atol=1e-2, rtol=1e-2), "mismatch vs bf16 ref (B=300)"

    print("KERNEL_OK")
</pallas_src>

<mosaic_0001>
module attributes {stable_mosaic.version = 11 : i64} {
  func.func @expert_kernel(%arg0: i32, %arg1: i32, %arg2: memref<16x32xbf16, #tpu.memory_space<vmem>>, %arg3: memref<32x128xbf16, #tpu.memory_space<vmem>>, %arg4: memref<1x128xf32, #tpu.memory_space<vmem>>, %arg5: memref<128x128xbf16, #tpu.memory_space<vmem>>, %arg6: memref<1x128xf32, #tpu.memory_space<vmem>>, %arg7: memref<16x128xf32, #tpu.memory_space<vmem>>, %arg8: memref<16x128xf32, #tpu.memory_space<vmem>>) attributes {dimension_semantics = [#tpu.dimension_semantics<parallel>, #tpu.dimension_semantics<arbitrary>], iteration_bounds = array<i64: 1, 1>, scalar_prefetch = 0 : i64, scratch_operands = 1 : i64, tpu.core_type = #tpu.core_type<tc>, window_params = [{transform_indices = @transform_0, window_bounds = array<i64: 16, 32>}, {transform_indices = @transform_1, window_bounds = array<i64: 32, 128>}, {transform_indices = @transform_2, window_bounds = array<i64: 1, 128>}, {transform_indices = @transform_3, window_bounds = array<i64: 128, 128>}, {pipeline_mode = #tpu.pipeline_mode<synchronous>, transform_indices = @transform_4, window_bounds = array<i64: 1, 128>}, {transform_indices = @transform_5, window_bounds = array<i64: 16, 128>}]} {
    %c0_i32 = arith.constant 0 : i32
    %0 = arith.cmpi eq, %arg1, %c0_i32 : i32
    %1 = arith.extui %0 : i1 to i32
    %c0_i32_0 = arith.constant 0 : i32
    %2 = arith.cmpi ne, %1, %c0_i32_0 : i32
    scf.if %2 {
      %cst_16 = arith.constant 0.000000e+00 : f32
      %20 = vector.broadcast %cst_16 : f32 to vector<16x128xf32>
      %c0_17 = arith.constant 0 : index
      %c0_18 = arith.constant 0 : index
      %21 = vector.load %arg8[%c0_17, %c0_18] : memref<16x128xf32, #tpu.memory_space<vmem>>, vector<16x128xf32>
      tpu.vector_store %arg8[%c0_17, %c0_18], %20 {strides = array<i32>} : memref<16x128xf32, #tpu.memory_space<vmem>>, vector<16x128xf32>,
    } else {
    }
    %c0 = arith.constant 0 : index
    %c0_1 = arith.constant 0 : index
    %3 = vector.load %arg2[%c0, %c0_1] : memref<16x32xbf16, #tpu.memory_space<vmem>>, vector<16x32xbf16>
    %c0_2 = arith.constant 0 : index
    %c0_3 = arith.constant 0 : index
    %4 = vector.load %arg3[%c0_2, %c0_3] : memref<32x128xbf16, #tpu.memory_space<vmem>>, vector<32x128xbf16>
    %cst = arith.constant dense<0.000000e+00> : vector<16x128xf32>
    %5 = tpu.matmul %3, %4, %cst {dimension_numbers = #tpu.dot_dimension_numbers<[1], [0], [0], [1], [0, 0, 1, 1], [], []>} : vector<16x32xbf16>, vector<32x128xbf16>, vector<16x128xf32> -> vector<16x128xf32>
    %c0_4 = arith.constant 0 : index
    %c0_5 = arith.constant 0 : index
    %6 = vector.load %arg4[%c0_4, %c0_5] : memref<1x128xf32, #tpu.memory_space<vmem>>, vector<1x128xf32>
    %7 = vector.broadcast %6 : vector<1x128xf32> to vector<16x128xf32>
    %8 = arith.addf %5, %7 : vector<16x128xf32>
    %cst_6 = arith.constant 0.000000e+00 : f32
    %9 = vector.broadcast %cst_6 : f32 to vector<16x128xf32>
    %10 = arith.maximumf %8, %9 : vector<16x128xf32>
    %c0_7 = arith.constant 0 : index
    %c0_8 = arith.constant 0 : index
    %11 = vector.load %arg8[%c0_7, %c0_8] : memref<16x128xf32, #tpu.memory_space<vmem>>, vector<16x128xf32>
    %12 = arith.truncf %10 : vector<16x128xf32> to vector<16x128xbf16>
    %c0_9 = arith.constant 0 : index
    %c0_10 = arith.constant 0 : index
    %13 = vector.load %arg5[%c0_9, %c0_10] : memref<128x128xbf16, #tpu.memory_space<vmem>>, vector<128x128xbf16>
    %cst_11 = arith.constant dense<0.000000e+00> : vector<16x128xf32>
    %14 = tpu.matmul %12, %13, %cst_11 {dimension_numbers = #tpu.dot_dimension_numbers<[1], [0], [0], [1], [0, 0, 1, 1], [], []>} : vector<16x128xbf16>, vector<128x128xbf16>, vector<16x128xf32> -> vector<16x128xf32>
    %15 = arith.addf %11, %14 : vector<16x128xf32>
    %c0_12 = arith.constant 0 : index
    %c0_13 = arith.constant 0 : index
    %16 = vector.load %arg8[%c0_12, %c0_13] : memref<16x128xf32, #tpu.memory_space<vmem>>, vector<16x128xf32>
    tpu.vector_store %arg8[%c0_12, %c0_13], %15 {strides = array<i32>} : memref<16x128xf32, #tpu.memory_space<vmem>>, vector<16x128xf32>,
    %c0_i32_14 = arith.constant 0 : i32
    %17 = arith.cmpi eq, %arg1, %c0_i32_14 : i32
    %18 = arith.extui %17 : i1 to i32
    %c0_i32_15 = arith.constant 0 : i32
    %19 = arith.cmpi ne, %18, %c0_i32_15 : i32
    scf.if %19 {
      %c0_16 = arith.constant 0 : index
      %c0_17 = arith.constant 0 : index
      %20 = vector.load %arg8[%c0_16, %c0_17] : memref<16x128xf32, #tpu.memory_space<vmem>>, vector<16x128xf32>
      %c0_18 = arith.constant 0 : index
      %c0_19 = arith.constant 0 : index
      %21 = vector.load %arg6[%c0_18, %c0_19] : memref<1x128xf32, #tpu.memory_space<vmem>>, vector<1x128xf32>
      %22 = vector.broadcast %21 : vector<1x128xf32> to vector<16x128xf32>
      %23 = arith.addf %20, %22 : vector<16x128xf32>
      %c0_20 = arith.constant 0 : index
      %c0_21 = arith.constant 0 : index
      %24 = vector.load %arg7[%c0_20, %c0_21] : memref<16x128xf32, #tpu.memory_space<vmem>>, vector<16x128xf32>
      tpu.vector_store %arg7[%c0_20, %c0_21], %23 {strides = array<i32>} : memref<16x128xf32, #tpu.memory_space<vmem>>, vector<16x128xf32>,
    } else {
    }
    return
  }
  func.func @transform_0(%arg0: i32, %arg1: i32) -> (i32, i32) {
    %c0_i32 = arith.constant 0 : i32
    %c0_i32_0 = arith.constant 0 : i32
    return %arg0, %c0_i32 : i32, i32
  }
  func.func @transform_1(%arg0: i32, %arg1: i32) -> (i32, i32) {
    %c0_i32 = arith.constant 0 : i32
    %c0_i32_0 = arith.constant 0 : i32
    return %c0_i32, %arg1 : i32, i32
  }
  func.func @transform_2(%arg0: i32, %arg1: i32) -> (i32, i32) {
    %c0_i32 = arith.constant 0 : i32
    %c0_i32_0 = arith.constant 0 : i32
    return %c0_i32, %arg1 : i32, i32
  }
  func.func @transform_3(%arg0: i32, %arg1: i32) -> (i32, i32) {
    %c0_i32 = arith.constant 0 : i32
    %c0_i32_0 = arith.constant 0 : i32
    return %arg1, %c0_i32 : i32, i32
  }
  func.func @transform_4(%arg0: i32, %arg1: i32) -> (i32, i32) {
    %c0_i32 = arith.constant 0 : i32
    %c0_i32_0 = arith.constant 0 : i32
    %c0_i32_1 = arith.constant 0 : i32
    return %c0_i32, %c0_i32_0 : i32, i32
  }
  func.func @transform_5(%arg0: i32, %arg1: i32) -> (i32, i32) {
    %c0_i32 = arith.constant 0 : i32
    %c0_i32_0 = arith.constant 0 : i32
    return %arg0, %c0_i32 : i32, i32
  }
}

</mosaic_0001>

<bundles_post_ra>
// kernel: tpu_custom_call.1
= control target key start
LH: loop header
LB: loop body
LE: loop exit
PB: predicated region body
PF: predicated region fallthrough
CT: control target
= control target key end

     0   :  { %10 = vsyncpa [#allocation4], 0  ;;  %s511_s0 = inlined_call_operand.hbm [shape: bf16[16,32], index: 0, kind: input, shape index: {}]   ;;  %s512_s1 = inlined_call_operand.hbm [shape: bf16[32,128], index: 1, kind: input, shape index: {}]   ;;  %s513_s2 = inlined_call_operand.vmem [shape: f32[1,128], index: 2, kind: input, shape index: {}]   ;;  %s514_s3 = inlined_call_operand.hbm [shape: bf16[128,128], index: 3, kind: input, shape index: {}]   ;;  %s515_s4 = inlined_call_operand.vmem [shape: f32[1,128], index: 4, kind: input, shape index: {}]   ;;  %s516_s5 = inlined_call_operand.hbm [shape: f32[16,128], index: 5, kind: output, shape index: {}]  }
   0x1   :  { %11 = vsyncpa [#allocation7], 0 }
   0x2   :  { %12 = vsyncpa [#allocation5], 0  ;;  %s453_s18 = smov [#allocation6]   ;;  %s454_s20 = smov [#allocation3]  }
   0x3   :  { %s30_s19 = sshll.u32 %s453_s18, 4  ;;  %s18_s21 = sshll.u32 %s454_s20, 4  ;;  %s31_s19 = int_to_ptr.vmem [resolvable:$true] %s30_s19  ;;  %s19_s21 = int_to_ptr.vmem [resolvable:$true] %s18_s21 }
   0x4   :  { %s375_s22 = scalar_lea.vmem %s31_s19, 256  ;;  %p380_p1 = scmp.lt.s32.totalorder %s31_s19, %s31_s19 }
   0x5   :  { %p376_p0 = scmp.ne.s32.totalorder %s31_s19, %s375_s22  ;;  %p381_p2 = scmp.lt.s32.totalorder %s375_s22, %s375_s22 }
   0x7   :  { %p382_p3 = por %p381_p2, %p380_p1 }
   0x9   :  { %p383_p4 = pnand %p382_p3, %p376_p0 }
   0xb   :  { %386 = shalt.err (!%p383_p4)
}
   0xc   :  { %s455_s23 = smov 64   ;;  %s456_s24 = smov 4  }
   0xd   :  { %36 = dma.hbm_to_vmem [thread:$0]  %s512_s1, 256, %s31_s19, [#allocation7], %s455_s23, %s455_s23, %s456_s24  }
   0xe   :  { %s395_s27 = scalar_lea.vmem %s19_s21, 128  ;;  %p400_p6 = scmp.lt.s32.totalorder %s19_s21, %s19_s21 }
   0xf   :  { %p396_p5 = scmp.ne.s32.totalorder %s19_s21, %s395_s27  ;;  %p401_p7 = scmp.lt.s32.totalorder %s395_s27, %s395_s27 }
  0x11   :  { %p402_p8 = por %p401_p7, %p400_p6 }
  0x13   :  { %p403_p9 = pnand %p402_p8, %p396_p5 }
  0x15   :  { %406 = shalt.err (!%p403_p9)
}
  0x16   :  { %24 = dma.hbm_to_vmem [thread:$0]  %s511_s0, 128, %s19_s21, [#allocation4], %s455_s23, %s455_s23, %s456_s24  }
  0x17   :  { %s457_s30 = smov [#allocation8]  }
  0x18   :  { %s44_s6 = sshll.u32 %s457_s30, 4  ;;  %s45_s6 = int_to_ptr.vmem [resolvable:$true] %s44_s6 }
  0x19   :  { %s415_s7 = scalar_lea.vmem %s45_s6, 1024  ;;  %p420_p11 = scmp.lt.s32.totalorder %s45_s6, %s45_s6 }
  0x1a   :  { %p416_p10 = scmp.ne.s32.totalorder %s45_s6, %s415_s7  ;;  %p421_p12 = scmp.lt.s32.totalorder %s415_s7, %s415_s7 }
  0x1c   :  { %p422_p13 = por %p421_p12, %p420_p11 }
  0x1e   :  { %p423_p0 = pnand %p422_p13, %p416_p10 }
  0x20   :  { %426 = shalt.err (!%p423_p0)
}
  0x21   :  { %50 = dma.hbm_to_vmem [thread:$0]  %s514_s3, 1024, %s45_s6, [#allocation7], %s455_s23, %s455_s23, %s456_s24  }
  0x22   :  { %447 = dma.done.wait [#allocation4], 128  }
  0x23   :  { %448 = vsyncadd [#allocation4], 4294967168 }
  0x24   :  { %449 = dma.done.wait [#allocation7], 1280  }
  0x25   :  { %450 = vsyncadd [#allocation7], 4294966016  ;;  %v458_v0 = vmov 0.0   ;;  %vm459_vm0 = vmmov 0   ;;  %v356_v1 = vld [vmem:[#allocation6 + $0x8] sm:$0xff]   ;;  %v357_v2 = vld [vmem:[#allocation6] sm:$0xff]  }
  0x26   :  { %318 = vmatprep.subr.bf16.mxu0 %v458_v0  ;;  %322 = vmatprep.mubr.msk.bf16.mxu0 %vm459_vm0, %v458_v0  ;;  %v359_v3 = vld [vmem:[#allocation8 + $0x38] sm:$0xff]   ;;  %v358_v4 = vld [vmem:[#allocation3] sm:$0xff]   ;;  %v360_v5 = vld [vmem:[#allocation8 + $0x30] sm:$0xff]   ;;  %vm99_vm1 = vcmask 261120   ;;  %s460_s11 = smov [#allocation9]  }
  0x27   :  { %326 = vmatprep.subr.bf16.mxu1 %v458_v0  ;;  %342 = vmatprep.mubr.msk.bf16.mxu1 %vm459_vm0, %v458_v0  ;;  %v361_v6 = vld [vmem:[#allocation8 + $0x28] sm:$0xff]   ;;  %v362_v7 = vld [vmem:[#allocation8 + $0x20] sm:$0xff]   ;;  %v363_v8 = vld [vmem:[#allocation8 + $0x18] sm:$0xff]   ;;  %s279_s12 = sshll.u32 %s460_s11, 4  ;;  %s280_s12 = int_to_ptr.vmem [resolvable:$true] %s279_s12 }
  0x28   :  { %319 = vmatpush3.bf16.msra.mxu0 %v356_v1  ;;  %327 = vmatpush3.bf16.msra.mxu1 %v359_v3  ;;  %v364_v9 = vld [vmem:[#allocation8 + $0x10] sm:$0xff]   ;;  %v365_v10 = vld [vmem:[#allocation8 + $0x8] sm:$0xff]   ;;  %v366_v11 = vld [vmem:[#allocation8] sm:$0xff]   ;;  %p432_p2 = scmp.lt.s32.totalorder %s280_s12, %s280_s12 }
  0x29   :  { %320 = vmatprep.subr.bf16.mxu0 %v458_v0  ;;  %328 = vmatprep.subr.bf16.mxu1 %v458_v0  ;;  %v292_v12 = vld [vmem:[%s513_s2] ss:$0 sm:$0xff]  ;;  %s427_s2 = scalar_lea.vmem %s280_s12, 256 }
  0x2a   :  { %v305_v22 = vld [vmem:[%s515_s4] ss:$0 sm:$0xff]  ;;  %p428_p1 = scmp.ne.s32.totalorder %s280_s12, %s427_s2  ;;  %p433_p3 = scmp.lt.s32.totalorder %s427_s2, %s427_s2 }
  0x2c   :  { %321 = vmatpush3.bf16.msra.mxu0 %v357_v2  ;;  %329 = vmatpush3.bf16.msra.mxu1 %v360_v5  ;;  %p434_p4 = por %p433_p3, %p432_p2 }
  0x2d   :  { %330 = vmatprep.subr.bf16.mxu1 %v458_v0 }
  0x2e   :  { %p435_p5 = pnand %p434_p4, %p428_p1 }
  0x2f   :  { %323 = vmatmul.mubr.msk.bf16.vlgmr.msra.gmra.mxu0 %vm99_vm1, %v358_v4 }
  0x30   :  { %331 = vmatpush3.bf16.msra.mxu1 %v361_v6 }
  0x31   :  { %332 = vmatprep.subr.bf16.mxu1 %v458_v0 }
  0x34   :  { %333 = vmatpush3.bf16.msra.mxu1 %v362_v7 }
  0x35   :  { %334 = vmatprep.subr.bf16.mxu1 %v458_v0 }
  0x38   :  { %335 = vmatpush3.bf16.msra.mxu1 %v363_v8 }
  0x39   :  { %336 = vmatprep.subr.bf16.mxu1 %v458_v0 }
  0x3c   :  { %337 = vmatpush3.bf16.msra.mxu1 %v364_v9 }
  0x3d   :  { %338 = vmatprep.subr.bf16.mxu1 %v458_v0 }
  0x40   :  { %339 = vmatpush3.bf16.msra.mxu1 %v365_v10 }
  0x41   :  { %340 = vmatprep.subr.bf16.mxu1 %v458_v0 }
  0x44   :  { %341 = vmatpush3.bf16.msra.mxu1 %v366_v11 }
  0xef   :  { %v137_v13 = vpop.f32.mrf.mxu0 }
  0xf0   :  { %v138_v15 = vadd.f32 %v292_v12, %v137_v13 }
  0xf1   :  { %v324_v14 = vpop.f32.mrf.mxu0 }
  0xf2   :  { %v144_v19 = vmax.f32 %v138_v15, 0.0 }
  0xf3   :  { %v140_v16 = vpop.f32.mrf.mxu0 }
  0xf4   :  { %v141_v17 = vadd.f32 %v292_v12, %v140_v16 }
  0xf5   :  { %v325_v18 = vpop.f32.mrf.mxu0 }
  0xf6   :  { %v145_v20 = vmax.f32 %v141_v17, 0.0 }
  0xf8   :  { %v148_v21 = vpack.c.bf16 %v145_v20, %v144_v19 }
  0xfa   :  { %343 = vmatmul.mubr.bf16.vlgmr.msra.gmra.mxu1 %v148_v21 }
 0x1ba   :  { %v247_v23 = vpop.f32.mrf.mxu1 }
 0x1bb   :  { %v270_v24 = vadd.f32 %v305_v22, %v247_v23 }
 0x1bc   :  { %v344_v25 = vpop.f32.mrf.mxu1 }
 0x1bd   :  { %272 = vst [vmem:[#allocation9] sm:$0xff] %v270_v24 }
 0x1be   :  { %v250_v26 = vpop.f32.mrf.mxu1 }
 0x1bf   :  { %v271_v27 = vadd.f32 %v305_v22, %v250_v26 }
 0x1c0   :  { %v345_v28 = vpop.f32.mrf.mxu1 }
 0x1c1   :  { %273 = vst [vmem:[#allocation9 + $0x8] sm:$0xff] %v271_v27 }
 0x1c2   :  { %438 = shalt.err (!%p435_p5)
}
 0x1c3   :  { %s461_s13 = smov 128   ;;  %s462_s4 = smov 8  }
 0x1c4   :  { %285 = dma.vmem_to_hbm [thread:$0]  %s280_s12, 256, %s516_s5, [#allocation5], %s461_s13, %s461_s13, %s462_s4  }
 0x1c5   :  { %451 = dma.done.wait [#allocation5], 256  }
 0x1c6   :  { %452 = vsyncadd [#allocation5], 4294967040 }
 0x1c7   :  { %289 = vsyncpa [#allocation4], 1 }
 0x1c8   :  { %290 = vsyncpa [#allocation7], 1 }
 0x1c9   :  { %291 = vsyncpa [#allocation5], 1 }

</bundles_post_ra>
